<compile_context>
chip_gen: v7x
topology: tpu7x:2x2x1
jax: 0.10.0
libtpu: 0.0.40
codegen_flags: <defaults>
</compile_context>

<pallas_src>
from functools import partial

import jax
import jax.numpy as jnp
from jax import lax
from jax.experimental import pallas as pl
from jax.experimental.pallas import tpu as pltpu


_VMEM_LIMIT = 48 * 1024 * 1024  # keeps headroom under v7x's 64 MiB per-TC cap


def _pick_tile(n, preferred):
    """Largest 8-aligned divisor of n that is <= preferred (or n itself)."""
    if n <= preferred:
        return n
    start = preferred - (preferred % 8)
    for cand in range(start, 7, -8):
        if n % cand == 0:
            return cand
    # TODO(synk): pad N to a multiple of 128 + mask instead of full-extent fallback.
    return n


# --------------------------------------------------------------------------
# 1) Fused QKV projection: x (B,N,C) @ (C,C) weights -> q,k,v in (B,H,N,D).
# --------------------------------------------------------------------------
def qkv_proj_kernel(x_ref, wq_ref, wk_ref, wv_ref, q_ref, k_ref, v_ref, *,
                    num_heads, head_dim):
    x = x_ref[0]                                            # (tn, C) bf16

    def project_and_split(w_ref, out_ref):
        # Full-width MXU feed: (tn, C) @ (C, C), f32 accumulation.
        y = jnp.dot(x, w_ref[...], preferred_element_type=jnp.float32)
        for h in range(num_heads):                          # static unrolled split
            out_ref[0, h] = y[:, h * head_dim:(h + 1) * head_dim].astype(out_ref.dtype)

    project_and_split(wq_ref, q_ref)    # softmax scale already folded into wq
    project_and_split(wk_ref, k_ref)
    project_and_split(wv_ref, v_ref)


# --------------------------------------------------------------------------
# 2) Flash attention with online softmax over kv tiles.
# --------------------------------------------------------------------------
def flash_kernel(q_ref, k_ref, v_ref, o_ref, m_ref, l_ref, acc_ref):
    ki = pl.program_id(3)

    @pl.when(ki == 0)
    def _():
        m_ref[...] = jnp.full_like(m_ref, -jnp.inf)
        l_ref[...] = jnp.zeros_like(l_ref)
        acc_ref[...] = jnp.zeros_like(acc_ref)

    q = q_ref[0, 0]   # (tq, D) bf16 (pre-scaled via Wq)
    k = k_ref[0, 0]   # (tk, D) bf16
    v = v_ref[0, 0]   # (tk, D) bf16

    # q @ k^T by contracting the last dims of both (no scale multiply needed).
    s = lax.dot_general(q, k, (((1,), (1,)), ((), ())),
                        preferred_element_type=jnp.float32)          # (tq, tk) f32

    m_prev = m_ref[...]                                              # (tq, 1)
    m_new = jnp.maximum(m_prev, jnp.max(s, axis=-1, keepdims=True))
    alpha = jnp.exp(m_prev - m_new)                                  # (tq, 1) f32
    # NOTE: exp kept in f32 for portability (v5e has no bf16 EUP). On v6e/v7x
    # cast (s - m_new) to bf16 before exp if profiling shows EUP saturation.
    p = jnp.exp(s - m_new)                                           # (tq, tk) f32

    l_ref[...] = alpha * l_ref[...] + jnp.sum(p, axis=-1, keepdims=True)
    acc_ref[...] = alpha * acc_ref[...] + jnp.dot(
        p.astype(v.dtype), v, preferred_element_type=jnp.float32)    # (tq, D) f32
    m_ref[...] = m_new

    @pl.when(ki == pl.num_programs(3) - 1)
    def _():
        inv_l = pl.reciprocal(l_ref[...], approx=True)
        o_ref[0, 0] = (acc_ref[...] * inv_l).astype(o_ref.dtype)


# --------------------------------------------------------------------------
# 3) Head merge + output projection: concat_h attn_out[b,h] @ Wp + bias.
# --------------------------------------------------------------------------
def out_proj_kernel(ao_ref, wp_ref, b_ref, o_ref, merge_ref, *, num_heads, head_dim):
    # Merge heads into a lane-dense (tn, C) tile: merge[:, h*D:(h+1)*D] = ao[h].
    for h in range(num_heads):
        merge_ref[:, h * head_dim:(h + 1) * head_dim] = ao_ref[0, h]
    # Single full-depth (tn, C) @ (C, C) matmul; proj weight is resident.
    y = jnp.dot(merge_ref[...], wp_ref[...], preferred_element_type=jnp.float32)
    o_ref[0] = (y + b_ref[...].astype(jnp.float32)).astype(o_ref.dtype)


# --------------------------------------------------------------------------
# Weight preparation (one-off; do once and cache, not per forward call).
# --------------------------------------------------------------------------
def prepare_attention_params(w_qkv, w_proj, b_proj, *, num_heads,
                             mxu_dtype=jnp.bfloat16):
    """Pre-transpose / cast weights and fold the softmax scale into Wq."""
    three_c, C = w_qkv.shape
    assert three_c == 3 * C
    assert C % num_heads == 0
    D = C // num_heads
    scale = D ** (-0.5)
    wq = (w_qkv[0 * C:1 * C].T * scale).astype(mxu_dtype)   # (C, C), scale folded
    wk = w_qkv[1 * C:2 * C].T.astype(mxu_dtype)              # (C, C)
    wv = w_qkv[2 * C:3 * C].T.astype(mxu_dtype)              # (C, C)
    wp = w_proj.T.astype(mxu_dtype)                          # (C, C)
    b2 = b_proj.reshape(1, C).astype(jnp.float32)            # lane-dense bias
    return {"wq": wq, "wk": wk, "wv": wv, "wp": wp, "b": b2}


# --------------------------------------------------------------------------
# Wrapper
# --------------------------------------------------------------------------
def attention_forward(x, params, *, num_heads,
                      q_tile=512, kv_tile=1024, n_tile=256,
                      mxu_dtype=jnp.bfloat16):
    """Forward of vjepa.Attention (SDPA path). Returns (y, None) like torch.

    Tile notes: keep q/kv/n tiles >= 256 on BOTH v6e and v7x (2x256^2 MXUs);
    128 tiles are only appropriate on v5e.  Defaults are sized to amortize the
    ~0.35us per-grid-step overhead at head_dim ~64 while staying well inside
    the 48 MiB VMEM budget (which also fits v7x's 64 MiB per-TC cap).
    """
    B, N, C = x.shape
    H = num_heads
    assert C % H == 0, "dim must be divisible by num_heads"
    D = C // H

    tq = _pick_tile(N, q_tile)
    tk = _pick_tile(N, kv_tile)
    tn = _pick_tile(N, n_tile)

    x_c = x.astype(mxu_dtype)
    wq, wk, wv = params["wq"], params["wk"], params["wv"]
    wp, b2 = params["wp"], params["b"]

    # ---- kernel 1: fused QKV projection + head split ---------------------
    q, k, v = pl.pallas_call(
        partial(qkv_proj_kernel, num_heads=H, head_dim=D),
        out_shape=[jax.ShapeDtypeStruct((B, H, N, D), mxu_dtype)] * 3,
        grid_spec=pltpu.PrefetchScalarGridSpec(
            num_scalar_prefetch=0,
            grid=(B, N // tn),
            in_specs=[
                pl.BlockSpec((1, tn, C), lambda b, i: (b, i, 0)),
                pl.BlockSpec((C, C), lambda b, i: (0, 0)),   # resident weights
                pl.BlockSpec((C, C), lambda b, i: (0, 0)),
                pl.BlockSpec((C, C), lambda b, i: (0, 0)),
            ],
            out_specs=[pl.BlockSpec((1, H, tn, D), lambda b, i: (b, 0, i, 0))] * 3,
        ),
        compiler_params=pltpu.CompilerParams(
            dimension_semantics=("parallel", "parallel"),
            vmem_limit_bytes=_VMEM_LIMIT),
    )(x_c, wq, wk, wv)

    # ---- kernel 2: flash attention ---------------------------------------
    attn_out = pl.pallas_call(
        flash_kernel,
        out_shape=jax.ShapeDtypeStruct((B, H, N, D), mxu_dtype),
        grid_spec=pltpu.PrefetchScalarGridSpec(
            num_scalar_prefetch=0,
            grid=(B, H, N // tq, N // tk),
            in_specs=[
                pl.BlockSpec((1, 1, tq, D), lambda b, h, qi, ki: (b, h, qi, 0)),
                pl.BlockSpec((1, 1, tk, D), lambda b, h, qi, ki: (b, h, ki, 0)),
                pl.BlockSpec((1, 1, tk, D), lambda b, h, qi, ki: (b, h, ki, 0)),
            ],
            out_specs=pl.BlockSpec((1, 1, tq, D), lambda b, h, qi, ki: (b, h, qi, 0)),
            scratch_shapes=[
                pltpu.VMEM((tq, 1), jnp.float32),   # running max
                pltpu.VMEM((tq, 1), jnp.float32),   # running sum
                pltpu.VMEM((tq, D), jnp.float32),   # output accumulator
            ]),
        compiler_params=pltpu.CompilerParams(
            dimension_semantics=("parallel", "parallel", "parallel", "arbitrary"),
            vmem_limit_bytes=_VMEM_LIMIT),
    )(q, k, v)

    # ---- kernel 3: head merge + output projection -------------------------
    out = pl.pallas_call(
        partial(out_proj_kernel, num_heads=H, head_dim=D),
        out_shape=jax.ShapeDtypeStruct((B, N, C), x.dtype),
        grid_spec=pltpu.PrefetchScalarGridSpec(
            num_scalar_prefetch=0,
            grid=(B, N // tn),
            in_specs=[
                pl.BlockSpec((1, H, tn, D), lambda b, i: (b, 0, i, 0)),
                pl.BlockSpec((C, C), lambda b, i: (0, 0)),   # resident proj weight
                pl.BlockSpec((1, C), lambda b, i: (0, 0)),
            ],
            out_specs=pl.BlockSpec((1, tn, C), lambda b, i: (b, i, 0)),
            scratch_shapes=[pltpu.VMEM((tn, C), mxu_dtype)]),   # head-merge buffer
        compiler_params=pltpu.CompilerParams(
            dimension_semantics=("parallel", "parallel"),
            vmem_limit_bytes=_VMEM_LIMIT),
    )(attn_out, wp, b2)

    # Matches torch module: returns (x, attn) with attn=None on the SDPA path.
    return out, None


def attention_reference(x, w_qkv, w_proj, b_proj, *, num_heads):
    """Pure-JAX f32 reference mirroring the PyTorch forward (use_sdpa path)."""
    B, N, C = x.shape
    D = C // num_heads
    qkv = jnp.einsum("bnc,oc->bno", x, w_qkv)                    # (B, N, 3C)
    qkv = qkv.reshape(B, N, 3, num_heads, D).transpose(2, 0, 3, 1, 4)
    q, k, v = qkv[0], qkv[1], qkv[2]                             # (B, H, N, D)
    s = jnp.einsum("bhqd,bhkd->bhqk", q, k) * (D ** -0.5)
    p = jax.nn.softmax(s, axis=-1)
    o = jnp.einsum("bhqk,bhkd->bhqd", p, v)                      # (B, H, N, D)
    o = o.transpose(0, 2, 1, 3).reshape(B, N, C)
    return jnp.einsum("bnc,oc->bno", o, w_proj) + b_proj[None, None, :]


if __name__ == "__main__":
    B, N, C = 2, 16, 32
    NUM_HEADS = 4

    key = jax.random.PRNGKey(0)
    kx, kqkv, kproj, kb = jax.random.split(key, 4)

    x = jax.random.normal(kx, (B, N, C), dtype=jnp.float32)
    # nn.Linear(dim, 3*dim, bias=False): weight (3C, C)
    w_qkv = jax.random.normal(kqkv, (3 * C, C), dtype=jnp.float32) * 0.05
    # nn.Linear(dim, dim): weight (C, C), bias (C,)
    w_proj = jax.random.normal(kproj, (C, C), dtype=jnp.float32) * 0.05
    b_proj = jax.random.normal(kb, (C,), dtype=jnp.float32) * 0.01

    # Weight prep done once (cache in real use).
    params = prepare_attention_params(w_qkv, w_proj, b_proj, num_heads=NUM_HEADS)

    # Small tiles (8) so the multi-tile online-softmax path and the multi-tile
    # projection grids are exercised even at this tiny test shape.
    out, attn = attention_forward(x, params, num_heads=NUM_HEADS,
                                  q_tile=8, kv_tile=8, n_tile=8)
    out = jax.block_until_ready(out)

    ref = attention_reference(x, w_qkv, w_proj, b_proj, num_heads=NUM_HEADS)
    assert attn is None
    assert out.shape == (B, N, C)
    # bf16 MXU operands with f32 accumulation -> relaxed tolerance vs f32 ref.
    assert jnp.allclose(out, ref, atol=2e-2, rtol=2e-2), "mismatch vs reference"

    print("KERNEL_OK")
</pallas_src>

<mosaic_0001>
module attributes {stable_mosaic.version = 11 : i64} {
  func.func @qkv_proj_kernel(%arg0: i32, %arg1: i32, %arg2: memref<1x8x32xbf16, #tpu.memory_space<vmem>>, %arg3: memref<32x32xbf16, #tpu.memory_space<vmem>>, %arg4: memref<32x32xbf16, #tpu.memory_space<vmem>>, %arg5: memref<32x32xbf16, #tpu.memory_space<vmem>>, %arg6: memref<1x4x8x8xbf16, #tpu.memory_space<vmem>>, %arg7: memref<1x4x8x8xbf16, #tpu.memory_space<vmem>>, %arg8: memref<1x4x8x8xbf16, #tpu.memory_space<vmem>>) attributes {dimension_semantics = [#tpu.dimension_semantics<parallel>, #tpu.dimension_semantics<parallel>], iteration_bounds = array<i64: 2, 2>, scalar_prefetch = 0 : i64, scratch_operands = 0 : i64, tpu.core_type = #tpu.core_type<tc>, window_params = [{transform_indices = @transform_0, window_bounds = array<i64: 1, 8, 32>}, {pipeline_mode = #tpu.pipeline_mode<synchronous>, transform_indices = @transform_1, window_bounds = array<i64: 32, 32>}, {pipeline_mode = #tpu.pipeline_mode<synchronous>, transform_indices = @transform_2, window_bounds = array<i64: 32, 32>}, {pipeline_mode = #tpu.pipeline_mode<synchronous>, transform_indices = @transform_3, window_bounds = array<i64: 32, 32>}, {transform_indices = @transform_4, window_bounds = array<i64: 1, 4, 8, 8>}, {transform_indices = @transform_5, window_bounds = array<i64: 1, 4, 8, 8>}, {transform_indices = @transform_6, window_bounds = array<i64: 1, 4, 8, 8>}]} {
    %c0 = arith.constant 0 : index
    %c0_0 = arith.constant 0 : index
    %c0_1 = arith.constant 0 : index
    %0 = vector.load %arg2[%c0, %c0_0, %c0_1] : memref<1x8x32xbf16, #tpu.memory_space<vmem>>, vector<1x8x32xbf16>
    %1 = vector.shape_cast %0 : vector<1x8x32xbf16> to vector<8x32xbf16>
    %c0_2 = arith.constant 0 : index
    %c0_3 = arith.constant 0 : index
    %2 = vector.load %arg3[%c0_2, %c0_3] : memref<32x32xbf16, #tpu.memory_space<vmem>>, vector<32x32xbf16>
    %cst = arith.constant dense<0.000000e+00> : vector<8x32xf32>
    %3 = tpu.matmul %1, %2, %cst {dimension_numbers = #tpu.dot_dimension_numbers<[1], [0], [0], [1], [0, 0, 1, 1], [], []>} : vector<8x32xbf16>, vector<32x32xbf16>, vector<8x32xf32> -> vector<8x32xf32>
    %4 = vector.extract_strided_slice %3 {offsets = [0, 0], sizes = [8, 8], strides = [1, 1]} : vector<8x32xf32> to vector<8x8xf32>
    %5 = arith.truncf %4 : vector<8x8xf32> to vector<8x8xbf16>
    %c0_4 = arith.constant 0 : index
    %c0_5 = arith.constant 0 : index
    %c0_6 = arith.constant 0 : index
    %c0_7 = arith.constant 0 : index
    %6 = vector.load %arg6[%c0_4, %c0_5, %c0_6, %c0_7] : memref<1x4x8x8xbf16, #tpu.memory_space<vmem>>, vector<1x1x8x8xbf16>
    %7 = vector.shape_cast %6 : vector<1x1x8x8xbf16> to vector<8x8xbf16>
    %8 = vector.shape_cast %5 : vector<8x8xbf16> to vector<1x1x8x8xbf16>
    tpu.vector_store %arg6[%c0_4, %c0_5, %c0_6, %c0_7], %8 {strides = array<i32>} : memref<1x4x8x8xbf16, #tpu.memory_space<vmem>>, vector<1x1x8x8xbf16>,
    %9 = vector.extract_strided_slice %3 {offsets = [0, 8], sizes = [8, 8], strides = [1, 1]} : vector<8x32xf32> to vector<8x8xf32>
    %10 = arith.truncf %9 : vector<8x8xf32> to vector<8x8xbf16>
    %c0_8 = arith.constant 0 : index
    %c1 = arith.constant 1 : index
    %c0_9 = arith.constant 0 : index
    %c0_10 = arith.constant 0 : index
    %11 = vector.load %arg6[%c0_8, %c1, %c0_9, %c0_10] : memref<1x4x8x8xbf16, #tpu.memory_space<vmem>>, vector<1x1x8x8xbf16>
    %12 = vector.shape_cast %11 : vector<1x1x8x8xbf16> to vector<8x8xbf16>
    %13 = vector.shape_cast %10 : vector<8x8xbf16> to vector<1x1x8x8xbf16>
    tpu.vector_store %arg6[%c0_8, %c1, %c0_9, %c0_10], %13 {strides = array<i32>} : memref<1x4x8x8xbf16, #tpu.memory_space<vmem>>, vector<1x1x8x8xbf16>,
    %14 = vector.extract_strided_slice %3 {offsets = [0, 16], sizes = [8, 8], strides = [1, 1]} : vector<8x32xf32> to vector<8x8xf32>
    %15 = arith.truncf %14 : vector<8x8xf32> to vector<8x8xbf16>
    %c0_11 = arith.constant 0 : index
    %c2 = arith.constant 2 : index
    %c0_12 = arith.constant 0 : index
    %c0_13 = arith.constant 0 : index
    %16 = vector.load %arg6[%c0_11, %c2, %c0_12, %c0_13] : memref<1x4x8x8xbf16, #tpu.memory_space<vmem>>, vector<1x1x8x8xbf16>
    %17 = vector.shape_cast %16 : vector<1x1x8x8xbf16> to vector<8x8xbf16>
    %18 = vector.shape_cast %15 : vector<8x8xbf16> to vector<1x1x8x8xbf16>
    tpu.vector_store %arg6[%c0_11, %c2, %c0_12, %c0_13], %18 {strides = array<i32>} : memref<1x4x8x8xbf16, #tpu.memory_space<vmem>>, vector<1x1x8x8xbf16>,
    %19 = vector.extract_strided_slice %3 {offsets = [0, 24], sizes = [8, 8], strides = [1, 1]} : vector<8x32xf32> to vector<8x8xf32>
    %20 = arith.truncf %19 : vector<8x8xf32> to vector<8x8xbf16>
    %c0_14 = arith.constant 0 : index
    %c3 = arith.constant 3 : index
    %c0_15 = arith.constant 0 : index
    %c0_16 = arith.constant 0 : index
    %21 = vector.load %arg6[%c0_14, %c3, %c0_15, %c0_16] : memref<1x4x8x8xbf16, #tpu.memory_space<vmem>>, vector<1x1x8x8xbf16>
    %22 = vector.shape_cast %21 : vector<1x1x8x8xbf16> to vector<8x8xbf16>
    %23 = vector.shape_cast %20 : vector<8x8xbf16> to vector<1x1x8x8xbf16>
    tpu.vector_store %arg6[%c0_14, %c3, %c0_15, %c0_16], %23 {strides = array<i32>} : memref<1x4x8x8xbf16, #tpu.memory_space<vmem>>, vector<1x1x8x8xbf16>,
    %c0_17 = arith.constant 0 : index
    %c0_18 = arith.constant 0 : index
    %24 = vector.load %arg4[%c0_17, %c0_18] : memref<32x32xbf16, #tpu.memory_space<vmem>>, vector<32x32xbf16>
    %cst_19 = arith.constant dense<0.000000e+00> : vector<8x32xf32>
    %25 = tpu.matmul %1, %24, %cst_19 {dimension_numbers = #tpu.dot_dimension_numbers<[1], [0], [0], [1], [0, 0, 1, 1], [], []>} : vector<8x32xbf16>, vector<32x32xbf16>, vector<8x32xf32> -> vector<8x32xf32>
    %26 = vector.extract_strided_slice %25 {offsets = [0, 0], sizes = [8, 8], strides = [1, 1]} : vector<8x32xf32> to vector<8x8xf32>
    %27 = arith.truncf %26 : vector<8x8xf32> to vector<8x8xbf16>
    %c0_20 = arith.constant 0 : index
    %c0_21 = arith.constant 0 : index
    %c0_22 = arith.constant 0 : index
    %c0_23 = arith.constant 0 : index
    %28 = vector.load %arg7[%c0_20, %c0_21, %c0_22, %c0_23] : memref<1x4x8x8xbf16, #tpu.memory_space<vmem>>, vector<1x1x8x8xbf16>
    %29 = vector.shape_cast %28 : vector<1x1x8x8xbf16> to vector<8x8xbf16>
    %30 = vector.shape_cast %27 : vector<8x8xbf16> to vector<1x1x8x8xbf16>
    tpu.vector_store %arg7[%c0_20, %c0_21, %c0_22, %c0_23], %30 {strides = array<i32>} : memref<1x4x8x8xbf16, #tpu.memory_space<vmem>>, vector<1x1x8x8xbf16>,
    %31 = vector.extract_strided_slice %25 {offsets = [0, 8], sizes = [8, 8], strides = [1, 1]} : vector<8x32xf32> to vector<8x8xf32>
    %32 = arith.truncf %31 : vector<8x8xf32> to vector<8x8xbf16>
    %c0_24 = arith.constant 0 : index
    %c1_25 = arith.constant 1 : index
    %c0_26 = arith.constant 0 : index
    %c0_27 = arith.constant 0 : index
    %33 = vector.load %arg7[%c0_24, %c1_25, %c0_26, %c0_27] : memref<1x4x8x8xbf16, #tpu.memory_space<vmem>>, vector<1x1x8x8xbf16>
    %34 = vector.shape_cast %33 : vector<1x1x8x8xbf16> to vector<8x8xbf16>
    %35 = vector.shape_cast %32 : vector<8x8xbf16> to vector<1x1x8x8xbf16>
    tpu.vector_store %arg7[%c0_24, %c1_25, %c0_26, %c0_27], %35 {strides = array<i32>} : memref<1x4x8x8xbf16, #tpu.memory_space<vmem>>, vector<1x1x8x8xbf16>,
    %36 = vector.extract_strided_slice %25 {offsets = [0, 16], sizes = [8, 8], strides = [1, 1]} : vector<8x32xf32> to vector<8x8xf32>
    %37 = arith.truncf %36 : vector<8x8xf32> to vector<8x8xbf16>
    %c0_28 = arith.constant 0 : index
    %c2_29 = arith.constant 2 : index
    %c0_30 = arith.constant 0 : index
    %c0_31 = arith.constant 0 : index
    %38 = vector.load %arg7[%c0_28, %c2_29, %c0_30, %c0_31] : memref<1x4x8x8xbf16, #tpu.memory_space<vmem>>, vector<1x1x8x8xbf16>
    %39 = vector.shape_cast %38 : vector<1x1x8x8xbf16> to vector<8x8xbf16>
    %40 = vector.shape_cast %37 : vector<8x8xbf16> to vector<1x1x8x8xbf16>
    tpu.vector_store %arg7[%c0_28, %c2_29, %c0_30, %c0_31], %40 {strides = array<i32>} : memref<1x4x8x8xbf16, #tpu.memory_space<vmem>>, vector<1x1x8x8xbf16>,
    %41 = vector.extract_strided_slice %25 {offsets = [0, 24], sizes = [8, 8], strides = [1, 1]} : vector<8x32xf32> to vector<8x8xf32>
    %42 = arith.truncf %41 : vector<8x8xf32> to vector<8x8xbf16>
    %c0_32 = arith.constant 0 : index
    %c3_33 = arith.constant 3 : index
    %c0_34 = arith.constant 0 : index
    %c0_35 = arith.constant 0 : index
    %43 = vector.load %arg7[%c0_32, %c3_33, %c0_34, %c0_35] : memref<1x4x8x8xbf16, #tpu.memory_space<vmem>>, vector<1x1x8x8xbf16>
    %44 = vector.shape_cast %43 : vector<1x1x8x8xbf16> to vector<8x8xbf16>
    %45 = vector.shape_cast %42 : vector<8x8xbf16> to vector<1x1x8x8xbf16>
    tpu.vector_store %arg7[%c0_32, %c3_33, %c0_34, %c0_35], %45 {strides = array<i32>} : memref<1x4x8x8xbf16, #tpu.memory_space<vmem>>, vector<1x1x8x8xbf16>,
    %c0_36 = arith.constant 0 : index
    %c0_37 = arith.constant 0 : index
    %46 = vector.load %arg5[%c0_36, %c0_37] : memref<32x32xbf16, #tpu.memory_space<vmem>>, vector<32x32xbf16>
    %cst_38 = arith.constant dense<0.000000e+00> : vector<8x32xf32>
    %47 = tpu.matmul %1, %46, %cst_38 {dimension_numbers = #tpu.dot_dimension_numbers<[1], [0], [0], [1], [0, 0, 1, 1], [], []>} : vector<8x32xbf16>, vector<32x32xbf16>, vector<8x32xf32> -> vector<8x32xf32>
    %48 = vector.extract_strided_slice %47 {offsets = [0, 0], sizes = [8, 8], strides = [1, 1]} : vector<8x32xf32> to vector<8x8xf32>
    %49 = arith.truncf %48 : vector<8x8xf32> to vector<8x8xbf16>
    %c0_39 = arith.constant 0 : index
    %c0_40 = arith.constant 0 : index
    %c0_41 = arith.constant 0 : index
    %c0_42 = arith.constant 0 : index
    %50 = vector.load %arg8[%c0_39, %c0_40, %c0_41, %c0_42] : memref<1x4x8x8xbf16, #tpu.memory_space<vmem>>, vector<1x1x8x8xbf16>
    %51 = vector.shape_cast %50 : vector<1x1x8x8xbf16> to vector<8x8xbf16>
    %52 = vector.shape_cast %49 : vector<8x8xbf16> to vector<1x1x8x8xbf16>
    tpu.vector_store %arg8[%c0_39, %c0_40, %c0_41, %c0_42], %52 {strides = array<i32>} : memref<1x4x8x8xbf16, #tpu.memory_space<vmem>>, vector<1x1x8x8xbf16>,
    %53 = vector.extract_strided_slice %47 {offsets = [0, 8], sizes = [8, 8], strides = [1, 1]} : vector<8x32xf32> to vector<8x8xf32>
    %54 = arith.truncf %53 : vector<8x8xf32> to vector<8x8xbf16>
    %c0_43 = arith.constant 0 : index
    %c1_44 = arith.constant 1 : index
    %c0_45 = arith.constant 0 : index
    %c0_46 = arith.constant 0 : index
    %55 = vector.load %arg8[%c0_43, %c1_44, %c0_45, %c0_46] : memref<1x4x8x8xbf16, #tpu.memory_space<vmem>>, vector<1x1x8x8xbf16>
    %56 = vector.shape_cast %55 : vector<1x1x8x8xbf16> to vector<8x8xbf16>
    %57 = vector.shape_cast %54 : vector<8x8xbf16> to vector<1x1x8x8xbf16>
    tpu.vector_store %arg8[%c0_43, %c1_44, %c0_45, %c0_46], %57 {strides = array<i32>} : memref<1x4x8x8xbf16, #tpu.memory_space<vmem>>, vector<1x1x8x8xbf16>,
    %58 = vector.extract_strided_slice %47 {offsets = [0, 16], sizes = [8, 8], strides = [1, 1]} : vector<8x32xf32> to vector<8x8xf32>
    %59 = arith.truncf %58 : vector<8x8xf32> to vector<8x8xbf16>
    %c0_47 = arith.constant 0 : index
    %c2_48 = arith.constant 2 : index
    %c0_49 = arith.constant 0 : index
    %c0_50 = arith.constant 0 : index
    %60 = vector.load %arg8[%c0_47, %c2_48, %c0_49, %c0_50] : memref<1x4x8x8xbf16, #tpu.memory_space<vmem>>, vector<1x1x8x8xbf16>
    %61 = vector.shape_cast %60 : vector<1x1x8x8xbf16> to vector<8x8xbf16>
    %62 = vector.shape_cast %59 : vector<8x8xbf16> to vector<1x1x8x8xbf16>
    tpu.vector_store %arg8[%c0_47, %c2_48, %c0_49, %c0_50], %62 {strides = array<i32>} : memref<1x4x8x8xbf16, #tpu.memory_space<vmem>>, vector<1x1x8x8xbf16>,
    %63 = vector.extract_strided_slice %47 {offsets = [0, 24], sizes = [8, 8], strides = [1, 1]} : vector<8x32xf32> to vector<8x8xf32>
    %64 = arith.truncf %63 : vector<8x8xf32> to vector<8x8xbf16>
    %c0_51 = arith.constant 0 : index
    %c3_52 = arith.constant 3 : index
    %c0_53 = arith.constant 0 : index
    %c0_54 = arith.constant 0 : index
    %65 = vector.load %arg8[%c0_51, %c3_52, %c0_53, %c0_54] : memref<1x4x8x8xbf16, #tpu.memory_space<vmem>>, vector<1x1x8x8xbf16>
    %66 = vector.shape_cast %65 : vector<1x1x8x8xbf16> to vector<8x8xbf16>
    %67 = vector.shape_cast %64 : vector<8x8xbf16> to vector<1x1x8x8xbf16>
    tpu.vector_store %arg8[%c0_51, %c3_52, %c0_53, %c0_54], %67 {strides = array<i32>} : memref<1x4x8x8xbf16, #tpu.memory_space<vmem>>, vector<1x1x8x8xbf16>,
    return
  }
  func.func @transform_0(%arg0: i32, %arg1: i32) -> (i32, i32, i32) {
    %c0_i32 = arith.constant 0 : i32
    %c0_i32_0 = arith.constant 0 : i32
    return %arg0, %arg1, %c0_i32 : i32, i32, i32
  }
  func.func @transform_1(%arg0: i32, %arg1: i32) -> (i32, i32) {
    %c0_i32 = arith.constant 0 : i32
    %c0_i32_0 = arith.constant 0 : i32
    %c0_i32_1 = arith.constant 0 : i32
    return %c0_i32, %c0_i32_0 : i32, i32
  }
  func.func @transform_2(%arg0: i32, %arg1: i32) -> (i32, i32) {
    %c0_i32 = arith.constant 0 : i32
    %c0_i32_0 = arith.constant 0 : i32
    %c0_i32_1 = arith.constant 0 : i32
    return %c0_i32, %c0_i32_0 : i32, i32
  }
  func.func @transform_3(%arg0: i32, %arg1: i32) -> (i32, i32) {
    %c0_i32 = arith.constant 0 : i32
    %c0_i32_0 = arith.constant 0 : i32
    %c0_i32_1 = arith.constant 0 : i32
    return %c0_i32, %c0_i32_0 : i32, i32
  }
  func.func @transform_4(%arg0: i32, %arg1: i32) -> (i32, i32, i32, i32) {
    %c0_i32 = arith.constant 0 : i32
    %c0_i32_0 = arith.constant 0 : i32
    %c0_i32_1 = arith.constant 0 : i32
    return %arg0, %c0_i32, %arg1, %c0_i32_0 : i32, i32, i32, i32
  }
  func.func @transform_5(%arg0: i32, %arg1: i32) -> (i32, i32, i32, i32) {
    %c0_i32 = arith.constant 0 : i32
    %c0_i32_0 = arith.constant 0 : i32
    %c0_i32_1 = arith.constant 0 : i32
    return %arg0, %c0_i32, %arg1, %c0_i32_0 : i32, i32, i32, i32
  }
  func.func @transform_6(%arg0: i32, %arg1: i32) -> (i32, i32, i32, i32) {
    %c0_i32 = arith.constant 0 : i32
    %c0_i32_0 = arith.constant 0 : i32
    %c0_i32_1 = arith.constant 0 : i32
    return %arg0, %c0_i32, %arg1, %c0_i32_0 : i32, i32, i32, i32
  }
}

</mosaic_0001>

<bundles_post_ra>
// kernel: tpu_custom_call.1
= control target key start
LH: loop header
LB: loop body
LE: loop exit
PB: predicated region body
PF: predicated region fallthrough
CT: control target
= control target key end

     0   :  { %s1690_s0 = inlined_call_operand.hbm [shape: bf16[2,16,32], index: 0, kind: input, shape index: {}]   ;;  %s1691_s1 = inlined_call_operand.hbm [shape: bf16[32,32], index: 1, kind: input, shape index: {}]   ;;  %s1692_s2 = inlined_call_operand.hbm [shape: bf16[32,32], index: 2, kind: input, shape index: {}]   ;;  %s1693_s3 = inlined_call_operand.hbm [shape: bf16[32,32], index: 3, kind: input, shape index: {}]   ;;  %s1694_s4 = inlined_call_operand.vmem [shape: bf16[2,4,16,8], index: 4, kind: output, shape index: {0}]   ;;  %s1695_s5 = inlined_call_operand.vmem [shape: bf16[2,4,16,8], index: 5, kind: output, shape index: {1}]   ;;  %s1696_s6 = inlined_call_operand.vmem [shape: bf16[2,4,16,8], index: 6, kind: output, shape index: {2}]  }
   0x1   :  { %1703 = sst [smem:[#allocation16_spill]] %s1691_s1 }
   0x2   :  { %1704 = sst [smem:[#allocation17_spill]] %s1692_s2 }
   0x3   :  { %1705 = sst [smem:[#allocation18_spill]] %s1693_s3 }
   0x4   :  { %1706 = sst [smem:[#allocation19_spill]] %s1696_s6 }
   0x5   :  { %12 = vsyncpa [#allocation3], 0 }
   0x6   :  { %14 = vsyncpa [#allocation3 + $0x1], 0 }
   0x7   :  { %15 = vsyncpa [#allocation5], 0 }
   0x8   :  { %16 = vsyncpa [#allocation8], 0  ;;  %s1366_s21 = smov 0   ;;  %s1368_s22 = smov 0  }
   0x9   :  { %s1370_s23 = smov 0   ;;  %s1372_s24 = smov 0  }
   0xa   :  { %s1374_s25 = smov 0   ;;  %s1376_s26 = smov 0  }
   0xb   :  { %s1378_s27 = smov 0   ;;  %s1380_s28 = smov 0  }
   0xc LB: > { %s1701_s29 = sadd.s32 4294967295, %s1318_s28   ;;  %p56_p0 = scmp.ne.s32.totalorder %s1294_s22, %s1290_s21  ;;  %s1318_s28 = sphi %s1380_s28, %s22_s28   ;;  %s1314_s27 = sphi %s1378_s27, %s1731_s27   ;;  %s1310_s26 = sphi %s1376_s26, %s1730_s26   ;;  %s1306_s25 = sphi %s1374_s25, %s1729_s25   ;;  %s1302_s24 = sphi %s1372_s24, %s1728_s24   ;;  %s1298_s23 = sphi %s1370_s23, %s1727_s23   ;;  %s1294_s22 = sphi %s1368_s22, %s1726_s22   ;;  %s1290_s21 = sphi %s1366_s21, %s1725_s21  }
   0xd   : > { %p1408_p1 = scmp.eq.s32.totalorder %s1701_s29, 0  ;;  %p931_p2 = scmp.ge.s32.totalorder %s1318_s28, 1 }
   0xe   : > { %p214_p3 = scmp.lt.s32.totalorder %s1318_s28, 5  ;;  %s1320_s9 = smov [#allocation4]  }
   0xf   : > { %s1707_s30 = scalar_select %p1408_p1, 1, 0 }
  0x10   : > { %p1416_p4 = por %p1408_p1, %p56_p0  ;;  %p1420_p5 = pnand %p931_p2, %p214_p3 }
  0x11   : > { %s226_s10 = sshll.u32 %s1320_s9, 4  ;;  %s1321_s12 = smov [#allocation6]   ;;  %s227_s10 = int_to_ptr.vmem [resolvable:$true] %s226_s10 }
  0x12   : > { %s1708_s7 = scalar_select %p1416_p4, 1, 0 }
  0x13   : > { %s1709_s8 = scalar_select %p1420_p5, 1, 0 }
  0x14   : > { %p1029_p6 = pneg %p1420_p5  ;;  %s239_s13 = sshll.u32 %s1321_s12, 4  ;;  %s1432_s13 = int_to_ptr.vmem [resolvable:$true] %s239_s13 }
  0x15   : > { %s1711_s1 = sld [smem:[#allocation16_spill]] }
  0x16   : > { %p1428_p7 = pnand %p1029_p6, %p1408_p1 }
  0x18   : > { %p1442_p9 = pneg %p1428_p7 }
  0x1b   : > { %s1130_s16 = scalar_lea.hbm %s1711_s1, 256 }
  0x1c   : > { %p1131_p8 = scmp.ne.s32.totalorder %s1711_s1, %s1130_s16  ;;  %p1137_p12 = scmp.lt.u32.totalorder %s1130_s16, %s1711_s1 }
  0x1e   : > { %p1133_p10 = pnand %p1442_p9, %p1131_p8 }
  0x20   : > { %p1134_p11 = pneg %p1133_p10 }
  0x22   : > { %p1139_p13 = pnand %p1137_p12, %p1134_p11 }
  0x24   : > { %1142 = shalt.err (!%p1139_p13)
}
  0x25   : > { %s1143_s9 = scalar_lea.vmem %s227_s10, 256  ;;  %p1151_p6 = scmp.lt.s32.totalorder %s227_s10, %s227_s10 }
  0x26   : > { %p1144_p0 = scmp.ne.s32.totalorder %s227_s10, %s1143_s9  ;;  %p1152_p1 = scmp.lt.s32.totalorder %s1143_s9, %s1143_s9 }
  0x28   : > { %p1146_p2 = pnand %p1144_p0, %p1442_p9  ;;  %p1153_p4 = por %p1152_p1, %p1151_p6 }
  0x2a   : > { %p1147_p3 = pneg %p1146_p2 }
  0x2c   : > { %p1154_p5 = pnand %p1153_p4, %p1147_p3 }
  0x2e   : > { %1157 = shalt.err (!%p1154_p5)
}
  0x2f   : > { %s1322_s12 = smov 64   ;;  %s1323_s14 = smov 4  }
  0x30   : > { %1032 = dma.hbm_to_vmem [thread:$0]  (!%p1428_p7), %s1711_s1, 256, %s227_s10, [#allocation5], %s1322_s12, %s1322_s12, %s1323_s14  }
  0x31   : > { %s1713_s2 = sld [smem:[#allocation17_spill]] }
  0x37   : > { %s1158_s20 = scalar_lea.hbm %s1713_s2, 256 }
  0x38   : > { %p1159_p1 = scmp.ne.s32.totalorder %s1713_s2, %s1158_s20  ;;  %p1165_p8 = scmp.lt.u32.totalorder %s1158_s20, %s1713_s2 }
  0x3a   : > { %p1161_p4 = pnand %p1159_p1, %p1442_p9 }
  0x3c   : > { %p1162_p5 = pneg %p1161_p4 }
  0x3e   : > { %p1167_p10 = pnand %p1165_p8, %p1162_p5 }
  0x40   : > { %1170 = shalt.err (!%p1167_p10)
}
  0x41   : > { %s1171_s10 = scalar_lea.vmem %s1432_s13, 256  ;;  %p1179_p0 = scmp.lt.s32.totalorder %s1432_s13, %s1432_s13 }
  0x42   : > { %p1172_p11 = scmp.ne.s32.totalorder %s1432_s13, %s1171_s10  ;;  %p1180_p2 = scmp.lt.s32.totalorder %s1171_s10, %s1171_s10 }
  0x44   : > { %p1174_p12 = pnand %p1172_p11, %p1442_p9  ;;  %p1181_p3 = por %p1180_p2, %p1179_p0 }
  0x46   : > { %p1175_p13 = pneg %p1174_p12 }
  0x48   : > { %p1182_p6 = pnand %p1181_p3, %p1175_p13 }
  0x4a   : > { %1185 = shalt.err (!%p1182_p6)
}
  0x4b   : > { %1035 = dma.hbm_to_vmem [thread:$0]  (!%p1428_p7), %s1713_s2, 256, %s1432_s13, [#allocation5], %s1322_s12, %s1322_s12, %s1323_s14  }
  0x4c   : > { %s1324_s15 = smov [#allocation7]   ;;  %s1714_s3 = sld [smem:[#allocation18_spill]] }
  0x4d   : > { %s252_s16 = sshll.u32 %s1324_s15, 4  ;;  %s253_s16 = int_to_ptr.vmem [resolvable:$true] %s252_s16 }
  0x52   : > { %s1186_s20 = scalar_lea.hbm %s1714_s3, 256 }
  0x53   : > { %p1187_p1 = scmp.ne.s32.totalorder %s1714_s3, %s1186_s20  ;;  %p1193_p8 = scmp.lt.u32.totalorder %s1186_s20, %s1714_s3 }
  0x55   : > { %p1189_p4 = pnand %p1187_p1, %p1442_p9 }
  0x57   : > { %p1190_p5 = pneg %p1189_p4 }
  0x59   : > { %p1195_p10 = pnand %p1193_p8, %p1190_p5 }
  0x5b   : > { %1198 = shalt.err (!%p1195_p10)
}
  0x5c   : > { %s1199_s13 = scalar_lea.vmem %s253_s16, 256  ;;  %p1207_p0 = scmp.lt.s32.totalorder %s253_s16, %s253_s16 }
  0x5d   : > { %p1200_p11 = scmp.ne.s32.totalorder %s253_s16, %s1199_s13  ;;  %p1208_p2 = scmp.lt.s32.totalorder %s1199_s13, %s1199_s13 }
  0x5f   : > { %p1202_p12 = pnand %p1200_p11, %p1442_p9  ;;  %p1209_p3 = por %p1208_p2, %p1207_p0 }
  0x61   : > { %p1203_p13 = pneg %p1202_p12 }
  0x63   : > { %p1210_p6 = pnand %p1209_p3, %p1203_p13 }
  0x65   : > { %1213 = shalt.err (!%p1210_p6)
}
  0x66   : > { %1038 = dma.hbm_to_vmem [thread:$0]  (!%p1428_p7), %s1714_s3, 256, %s253_s16, [#allocation8], %s1322_s12, %s1322_s12, %s1323_s14  }
  0x67   : > { %s1715_s19 = sadd.s32 4294967295, %s1318_s28   ;;  %s31_s11 = sadd.s32 1, %s1310_s26 }
  0x68   : > { %p145_p9 = scmp.eq.s32.totalorder %s1715_s19, 3  ;;  %p32_p1 = scmp.ge.s32.totalorder %s31_s11, 2 }
  0x69   : > { %s34_s29 = sadd.s32 1, %s1314_s27  ;;  %p50_p4 = scmp.ne.s32.totalorder %s1298_s23, %s1294_s22 }
  0x6a   : > { %p51_p5 = scmp.eq.s32.totalorder %s1318_s28, 0  ;;  %s1733_s11 = smov (%p32_p1, %s31_s11), 0 }
  0x6b   : > { %1716 = sst [smem:[#allocation15_spill]] %s1733_s11  ;;  %s1735_s29 = smov (!%p32_p1, %s34_s29), %s1314_s27 }
  0x6c   : > { %s39_s15 = ssub.s32 %s1310_s26, %s1733_s11  ;;  %s43_s17 = sadd.s32 1, %s1298_s23 }
  0x6d   : > { %p36_p8 = scmp.ge.s32.totalorder %s1735_s29, 2  ;;  %p1521_p7 = por %p145_p9, %p50_p4 }
  0x6e   : > { %p1525_p10 = por %p51_p5, %p50_p4  ;;  %s266_s16 = sand.u32 1, %s1298_s23  }
  0x6f   : > { %s1737_s29 = smov (%p36_p8, %s1735_s29), 0  ;;  %p1046_p11 = scmp.lt.s32.totalorder %s1318_s28, 4 }
  0x70   : > { %s936_s18 = sshll.u32 %s266_s16, 2  ;;  %s38_s20 = ssub.s32 %s1314_s27, %s1737_s29 }
  0x71   : > { %s40_s21 = sor.u32 %s39_s15, %s38_s20  ;;  %s937_s9 = sshll.u32 %s1314_s27, 1 }
  0x72   : > { %p41_p12 = scmp.eq.s32.totalorder %s40_s21, 0  ;;  %s275_s10 = sadd.s32 %s1310_s26, %s937_s9 }
  0x73   : > { %s938_s13 = sshll.u32 %s275_s10, 6  ;;  %s270_s1 = scalar_lea.vmem [#allocation2], %s936_s18 }
  0x74   : > { %s279_s6 = sshll.u32 %s270_s1, 4  ;;  %s1543_s11 = scalar_lea.hbm %s1690_s0, %s938_s13  ;;  %s1545_s6 = int_to_ptr.vmem [resolvable:$true] %s279_s6 }
  0x75   : > { %s1538_s19 = scalar_select %p41_p12, %s1298_s23, %s43_s17  }
  0x76   : > { %p1551_p13 = pnand %p1046_p11, %p1525_p10  ;;  %s267_s17 = scalar_lea.sflag [#allocation3], %s266_s16 }
  0x77   : > { %s1214_s18 = scalar_lea.hbm %s1543_s11, 64  ;;  %s1219_s14 = scalar_lea.hbm %s1690_s0, 256 }
  0x78   : > { %p1215_p0 = scmp.ne.s32.totalorder %s1543_s11, %s1214_s18  ;;  %p1216_p2 = pneg %p1551_p13 }
  0x79   : > { %p1220_p9 = scmp.lt.u32.totalorder %s1543_s11, %s1690_s0  ;;  %p1221_p1 = scmp.lt.u32.totalorder %s1219_s14, %s1214_s18 }
  0x7a   : > { %p1217_p3 = pnand %p1216_p2, %p1215_p0  ;;  %p1223_p5 = scmp.lt.u32.totalorder %s1214_s18, %s1543_s11 }
  0x7b   : > { %p1222_p4 = por %p1221_p1, %p1220_p9 }
  0x7c   : > { %p1218_p6 = pneg %p1217_p3 }
  0x7d   : > { %p1224_p8 = por %p1223_p5, %p1222_p4 }
  0x7f   : > { %p1225_p10 = pnand %p1224_p8, %p1218_p6 }
  0x81   : > { %1228 = shalt.err (!%p1225_p10)
}
  0x82   : > { %s1229_s16 = scalar_lea.vmem %s1545_s6, 64  ;;  %s1325_s9 = smov [#allocation2]  }
  0x83   : > { %p1230_p11 = scmp.ne.s32.totalorder %s1545_s6, %s1229_s16  ;;  %s1234_s10 = sshll.u32 %s1325_s9, 4  ;;  %s1235_s10 = int_to_ptr.vmem [resolvable:$false] %s1234_s10 }
  0x84   : > { %s1236_s13 = scalar_lea.vmem %s1235_s10, 128  ;;  %p1237_p3 = scmp.lt.s32.totalorder %s1545_s6, %s1235_s10 }
  0x85   : > { %p1232_p12 = pnand %p1230_p11, %p1216_p2  ;;  %p1238_p9 = scmp.lt.s32.totalorder %s1236_s13, %s1229_s16 }
  0x87   : > { %p1233_p0 = pneg %p1232_p12  ;;  %p1239_p1 = por %p1238_p9, %p1237_p3 }
  0x89   : > { %p1240_p4 = pnand %p1239_p1, %p1233_p0 }
  0x8b   : > { %1243 = shalt.err (!%p1240_p4)
}
  0x8c   : > { %1042 = dma.hbm_to_vmem [thread:$0]  (!%p1551_p13), %s1543_s11, 64, %s1545_s6, %s267_s17  }
  0x8d   : > { %p1720_p6 = scmp.ne.s32.totalorder %s1709_s8, 0 }
  0x8e   : > { %s1583_s1 = sand.u32 (!%p1720_p6), 1, %s1294_s22   ;;  %p1721_p2 = scmp.ne.s32.totalorder (!%p1720_p6), %s1708_s7, 0 }
  0x8f   : > { %288 = sbr.rel (%p1720_p6) target bundleno = 529 (0x211), region = 36  ;;  %s940_s18 = sshll.u32 (!%p1720_p6), %s1583_s1, 2 }
  0x90   : > { %s291_s2 = scalar_lea.sflag (!%p1720_p6), [#allocation3], %s1583_s1  ;;  %s294_s3 = scalar_lea.vmem (!%p1720_p6), [#allocation2], %s940_s18 }
  0x96   : > { %1277 = dma.done.wait (%p1721_p2), %s291_s2, 64  }
  0x97   : > { %1279 = vsyncadd (%p1721_p2), %s291_s2, 4294967232  ;;  %p1722_p5 = scmp.ne.s32.totalorder %s1707_s30, 0 }
  0x99   : > { %1281 = dma.done.wait (%p1722_p5), [#allocation5], 512  }
  0x9a   : > { %1283 = vsyncadd (%p1722_p5), [#allocation5], 4294966784 }
  0x9b   : > { %1285 = dma.done.wait (%p1722_p5), [#allocation8], 256  }
  0x9c   : > { %1287 = vsyncadd (%p1722_p5), [#allocation8], 4294967040  ;;  %v1326_v0 = vmov 0.0   ;;  %vm1327_vm0 = vmmov 0   ;;  %v1124_v1 = vld [vmem:[#allocation4] sm:$0xff]   ;;  %v1125_v2 = vld [vmem:[#allocation4 + $0x8] sm:$0xff]  }
  0x9d   : > { %991 = vmatprep.subr.bf16.mxu0 %v1326_v0  ;;  %999 = vmatprep.subr.bf16.mxu1 %v1326_v0  ;;  %v1126_v3 = vld [vmem:[#allocation6] sm:$0xff]   ;;  %v1127_v4 = vld [vmem:[#allocation6 + $0x8] sm:$0xff]   ;;  %vm360_vm1 = vcmask 261120   ;;  %v1128_v6 = vld [vmem:[#allocation7] sm:$0xff]   ;;  %s944_s30 = sshll.u32 %s1583_s1, 4  ;;  %vm405_vm2 = vcmask 60416  }
  0x9e   : > { %995 = vmatprep.mubr.msk.bf16.mxu0 %vm1327_vm0, %v1326_v0  ;;  %1003 = vmatprep.mubr.msk.bf16.mxu1 %vm1327_vm0, %v1326_v0  ;;  %v343_v5 = vld [vmem:[%s294_s3] sm:$0xf]  ;;  %v1129_v7 = vld [vmem:[#allocation7 + $0x8] sm:$0xff]   ;;  %s1328_s7 = smov 104   ;;  %s1329_s8 = smov 120  }
  0x9f   : > { %992 = vmatpush3.bf16.msra.mxu0 %v1124_v1  ;;  %1000 = vmatpush3.bf16.msra.mxu1 %v1126_v3  ;;  %s1603_s11 = scalar_lea.vmem [#allocation9], %s944_s30  ;;  %s1607_s6 = scalar_lea.vmem [#allocation10], %s944_s30 }
  0xa0   : > { %993 = vmatprep.subr.bf16.mxu0 %v1326_v0  ;;  %1001 = vmatprep.subr.bf16.mxu1 %v1326_v0  ;;  %s1330_s15 = smov 112   ;;  %s1611_s17 = scalar_lea.vmem [#allocation11], %s944_s30 }
  0xa1   : > { %s971_s14 = sshll.u32 (%p1521_p7), %s1306_s25, 3 }
  0xa2   : > { %s593_s20 = sadd.s32 (%p1521_p7), %s1302_s24, %s971_s14 }
  0xa3   : > { %994 = vmatpush3.bf16.msra.mxu0 %v1125_v2  ;;  %1002 = vmatpush3.bf16.msra.mxu1 %v1127_v4  ;;  %s972_s21 = sshll.u32 (%p1521_p7), %s593_s20, 2 }
  0xa4   : > { %1007 = vmatprep.subr.bf16.mxu0 %v1326_v0  ;;  %s595_s10 = scalar_lea.vmem (%p1521_p7), %s1694_s4, %s972_s21 }
  0xa6   : > { %996 = vmatmul.mubr.msk.bf16.vlgmr.msra.gmra.mrb[0].mxu0 %vm360_vm1, %v343_v5  ;;  %1004 = vmatmul.mubr.msk.bf16.vlgmr.msra.gmra.mrb[0].mxu1 %vm360_vm1, %v343_v5 }
  0xa7   : > { %1008 = vmatpush3.bf16.msra.mxu0 %v1128_v6  ;;  %1011 = vmatprep.mubr.msk.bf16.mxu0 %vm1327_vm0, %v1326_v0 }
  0xa8   : > { %1009 = vmatprep.subr.bf16.mxu0 %v1326_v0 }
  0xab   : > { %1010 = vmatpush3.bf16.msra.mxu0 %v1129_v7 }
  0xae   : > { %1012 = vmatmul.mubr.msk.bf16.vlgmr.msra.gmra.mrb[4].mxu0 %vm360_vm1, %v343_v5 }
 0x179   : > { %v398_v8 = vpop.f32.mrb[0].mxu0  ;;  %v475_v12 = vpop.f32.mrb[0].mxu1 }
 0x17a   : > { %v404_v9 = vpack.c.bf16 %v398_v8, %v398_v8  ;;  %v997_v10 = vpop.f32.mrb[1].mxu0  ;;  %v481_v14 = vpack.c.bf16 %v475_v12, %v475_v12  ;;  %v1005_v15 = vpop.f32.mrb[1].mxu1 }
 0x17b   : > { %v401_v11 = vpop.f32.mrb[2].mxu0  ;;  %v478_v16 = vpop.f32.mrb[2].mxu1 }
 0x17c   : > { %420 = vrot.lane.b32.xlu1 %v404_v9, %s1328_s7  ;;  %410 = vrot.lane.b32.xlu0 %v404_v9, %s1329_s8  ;;  %v998_v13 = vpop.f32.mrb[3].mxu0  ;;  %406 = vst.msk [vmem:[%s1603_s11] sm:$0xf] %vm405_vm2, %v404_v9  ;;  %v1006_v17 = vpop.f32.mrb[3].mxu1  ;;  %482 = vst.msk [vmem:[%s1607_s6] sm:$0xf] %vm405_vm2, %v481_v14 }
 0x180   : > { %486 = vrot.lane.b32.xlu1 %v481_v14, %s1329_s8  ;;  %415 = vrot.lane.b32.xlu0 %v404_v9, %s1330_s15 }
 0x181   : > { %v551_v18 = vpop.f32.mrb[4].mxu0 }
 0x182   : > { %v557_v19 = vpack.c.bf16 %v551_v18, %v551_v18  ;;  %v1013_v20 = vpop.f32.mrb[5].mxu0 }
 0x183   : > { %v554_v21 = vpop.f32.mrb[6].mxu0  ;;  %v611_v32 = vld [vmem:[%s1603_s11] sm:$0xf] (%p1521_p7) }
 0x184   : > { %496 = vrot.lane.b32.xlu1 %v481_v14, %s1328_s7  ;;  %491 = vrot.lane.b32.xlu0 %v481_v14, %s1330_s15  ;;  %v1014_v22 = vpop.f32.mrb[7].mxu0  ;;  %558 = vst.msk [vmem:[%s1611_s17] sm:$0xf] %vm405_vm2, %v557_v19  ;;  %612 = vst [vmem:[%s595_s10] sm:$0xf] (%p1521_p7), %v611_v32 }
 0x188   : > { %567 = vrot.lane.b32.xlu1 %v557_v19, %s1330_s15  ;;  %562 = vrot.lane.b32.xlu0 %v557_v19, %s1329_s8 }
 0x18c   : > { %572 = vrot.lane.b32.xlu0 %v557_v19, %s1328_s7 }
 0x1ee   : > { %v421_v23 = vpop.permute.xlu1 %420  ;;  %v411_v24 = vpop.permute.xlu0 %410 }
 0x1ef   : > { %953 = vst.msk [vmem:[%s1603_s11 + $0xc] sm:$0xf] %vm405_vm2, %v421_v23  ;;  %951 = vst.msk [vmem:[%s1603_s11 + $0x4] sm:$0xf] %vm405_vm2, %v411_v24 }
 0x1f2   : > { %v487_v25 = vpop.permute.xlu1 %486  ;;  %v416_v26 = vpop.permute.xlu0 %415 }
 0x1f3   : > { %958 = vst.msk [vmem:[%s1607_s6 + $0x4] sm:$0xf] %vm405_vm2, %v487_v25  ;;  %952 = vst.msk [vmem:[%s1603_s11 + $0x8] sm:$0xf] %vm405_vm2, %v416_v26 }
 0x1f6   : > { %v497_v27 = vpop.permute.xlu1 %496  ;;  %v492_v28 = vpop.permute.xlu0 %491  ;;  %v613_v33 = vld [vmem:[%s1603_s11 + $0x4] sm:$0xf] (%p1521_p7)  ;;  %v617_v35 = vld [vmem:[%s1603_s11 + $0xc] sm:$0xf] (%p1521_p7) }
 0x1f7   : > { %960 = vst.msk [vmem:[%s1607_s6 + $0xc] sm:$0xf] %vm405_vm2, %v497_v27  ;;  %959 = vst.msk [vmem:[%s1607_s6 + $0x8] sm:$0xf] %vm405_vm2, %v492_v28 }
 0x1f8   : > { %614 = vst [vmem:[%s595_s10 + $0x8] sm:$0xf] (%p1521_p7), %v613_v33  ;;  %618 = vst [vmem:[%s595_s10 + $0x18] sm:$0xf] (%p1521_p7), %v617_v35 }
 0x1f9   : > { %591 = sbr.rel (!%p1521_p7) target bundleno = 512 (0x200), region = 56 }
 0x1fa   : > { %v568_v29 = vpop.permute.xlu1 %567  ;;  %v563_v30 = vpop.permute.xlu0 %562  ;;  %v615_v34 = vld [vmem:[%s1603_s11 + $0x8] sm:$0xf] (%p1521_p7) }
 0x1fb   : > { %966 = vst.msk [vmem:[%s1611_s17 + $0x8] sm:$0xf] %vm405_vm2, %v568_v29  ;;  %965 = vst.msk [vmem:[%s1611_s17 + $0x4] sm:$0xf] %vm405_vm2, %v563_v30 }
 0x1fc   : > { %616 = vst [vmem:[%s595_s10 + $0x10] sm:$0xf] (%p1521_p7), %v615_v34 }
 0x1fe   : > { %v573_v31 = vpop.permute.xlu0 %572 }
 0x1ff   : > { %967 = vst.msk [vmem:[%s1611_s17 + $0xc] sm:$0xf] %vm405_vm2, %v573_v31 }
 0x200 PF: > { %649 = sbr.rel (!%p1521_p7) target bundleno = 519 (0x207), region = 97  ;;  %s973_s13 = sshll.u32 (%p1521_p7), %s1306_s25, 3  ;;  %v669_v36 = vld [vmem:[%s1607_s6] sm:$0xf] (%p1521_p7)  ;;  %v671_v37 = vld [vmem:[%s1607_s6 + $0x4] sm:$0xf] (%p1521_p7) }
 0x201   : > { %s651_s1 = sadd.s32 (%p1521_p7), %s1302_s24, %s973_s13  ;;  %v673_v38 = vld [vmem:[%s1607_s6 + $0x8] sm:$0xf] (%p1521_p7)  ;;  %v675_v39 = vld [vmem:[%s1607_s6 + $0xc] sm:$0xf] (%p1521_p7) }
 0x202   : > { %s974_s18 = sshll.u32 (%p1521_p7), %s651_s1, 2 }
 0x203   : > { %s653_s30 = scalar_lea.vmem (%p1521_p7), %s1695_s5, %s974_s18 }
 0x204   : > { %670 = vst [vmem:[%s653_s30] sm:$0xf] (%p1521_p7), %v669_v36  ;;  %672 = vst [vmem:[%s653_s30 + $0x8] sm:$0xf] (%p1521_p7), %v671_v37 }
 0x205   : > { %674 = vst [vmem:[%s653_s30 + $0x10] sm:$0xf] (%p1521_p7), %v673_v38  ;;  %676 = vst [vmem:[%s653_s30 + $0x18] sm:$0xf] (%p1521_p7), %v675_v39 }
 0x207 PF: > { %707 = sbr.rel (!%p1521_p7) target bundleno = 529 (0x211), region = 138  ;;  %s975_s7 = sshll.u32 (%p1521_p7), %s1306_s25, 3  ;;  %v727_v40 = vld [vmem:[%s1611_s17] sm:$0xf] (%p1521_p7)  ;;  %v729_v41 = vld [vmem:[%s1611_s17 + $0x4] sm:$0xf] (%p1521_p7) }
 0x208   : > { %s709_s8 = sadd.s32 (%p1521_p7), %s1302_s24, %s975_s7  ;;  %v731_v42 = vld [vmem:[%s1611_s17 + $0x8] sm:$0xf] (%p1521_p7)  ;;  %v733_v43 = vld [vmem:[%s1611_s17 + $0xc] sm:$0xf] (%p1521_p7)  ;;  %s1723_s14 = sld [smem:[#allocation19_spill]] (%p1521_p7) }
 0x209   : > { %s976_s11 = sshll.u32 (%p1521_p7), %s709_s8, 2 }
 0x20e   : > { %s711_s20 = scalar_lea.vmem %s1723_s14, %s976_s11 }
 0x20f   : > { %728 = vst [vmem:[%s711_s20] sm:$0xf] %v727_v40  ;;  %730 = vst [vmem:[%s711_s20 + $0x8] sm:$0xf] %v729_v41 }
 0x210   : > { %732 = vst [vmem:[%s711_s20 + $0x10] sm:$0xf] %v731_v42  ;;  %734 = vst [vmem:[%s711_s20 + $0x18] sm:$0xf] %v733_v43 }
 0x211 PF: > { %s22_s28 = sadd.s32 1, %s1318_s28   ;;  %s1724_s12 = sld [smem:[#allocation15_spill]] }
 0x212   : > { %p19_p7 = scmp.ge.s32.totalorder %s22_s28, 6   ;;  %s1725_s21 = smov %s1294_s22 }
 0x213   : > { %s1726_s22 = smov %s1298_s23  ;;  %s1727_s23 = smov %s1538_s19 }
 0x214   : > { %s1728_s24 = smov %s1310_s26  ;;  %s1729_s25 = smov %s1314_s27 }
 0x215   : > { %s1731_s27 = smov %s1737_s29  ;;  %21 = sbr.rel (!%p19_p7) target bundleno = 12 (0xc), region = 244 }
 0x217   : > { %s1730_s26 = smov %s1724_s12 }
 0x21c   :  { %789 = vsyncpa [#allocation3], 1 }
 0x21d   :  { %791 = vsyncpa [#allocation3 + $0x1], 1 }
 0x21e   :  { %792 = vsyncpa [#allocation5], 1 }
 0x21f   :  { %793 = vsyncpa [#allocation8], 1 }

</bundles_post_ra>
